<compile_context>
chip_gen: v5e
topology: v5e:2x2
jax: 0.10.0
libtpu: 0.0.40
codegen_flags: <defaults>
</compile_context>

<pallas_src>
import jax
import jax.numpy as jnp
from jax.experimental import pallas as pl
from jax.experimental.pallas import tpu as pltpu

EPS = 1e-5        # PyTorch nn.LayerNorm default
TILE_B = 256      # batch rows per grid step (review-suggested 256-512)


def _layernorm(h, gamma, beta):
    # Single-pass fused statistics (biased variance, like torch).
    mean = jnp.mean(h, axis=-1, keepdims=True)
    mean_sq = jnp.mean(h * h, axis=-1, keepdims=True)
    var = mean_sq - mean * mean
    inv = jax.lax.rsqrt(var + EPS)
    return (h - mean) * inv * gamma + beta


def residual_block_kernel(x_ref, w1t_ref, w2t_ref, p_ref, o_ref):
    x = x_ref[...]                     # (TB, C) f32 — kept f32 for residual
    p = p_ref[...]                     # (8, C)  f32 packed param vectors
    b1, g1, be1 = p[0:1, :], p[1:2, :], p[2:3, :]
    b2, g2, be2 = p[3:4, :], p[4:5, :], p[5:6, :]

    # Linear 1: bf16 inputs on the MXU, f32 accumulate.
    h = jnp.dot(x.astype(jnp.bfloat16), w1t_ref[...],
                preferred_element_type=jnp.float32) + b1
    h = _layernorm(h, g1, be1)
    h = jnp.maximum(h, 0.0)

    # Linear 2.
    h = jnp.dot(h.astype(jnp.bfloat16), w2t_ref[...],
                preferred_element_type=jnp.float32) + b2
    h = _layernorm(h, g2, be2)

    # Residual + final ReLU (f32 elementwise).
    o_ref[...] = jnp.maximum(x + h, 0.0).astype(o_ref.dtype)


def prepare_params(params):
    """One-time preprocessing: transpose + bf16 weights, pack LN/bias vectors."""
    C = params["w1"].shape[0]
    packed = jnp.concatenate(
        [params["b1"].reshape(1, C), params["g1"].reshape(1, C),
         params["be1"].reshape(1, C), params["b2"].reshape(1, C),
         params["g2"].reshape(1, C), params["be2"].reshape(1, C),
         jnp.zeros((2, C), jnp.float32)],                    # pad to 8 sublanes
        axis=0)
    return {
        "w1t": params["w1"].T.astype(jnp.bfloat16),          # (C, C) bf16
        "w2t": params["w2"].T.astype(jnp.bfloat16),          # (C, C) bf16
        "packed": packed,                                    # (8, C) f32
    }


def residual_block(x, prep):
    """x: (B, C) float32. prep: output of prepare_params()."""
    B, C = x.shape
    tile_b = min(TILE_B, B)            # block sublane dim: mult of 8 or == B
    grid = (pl.cdiv(B, tile_b),)

    return pl.pallas_call(
        residual_block_kernel,
        out_shape=jax.ShapeDtypeStruct((B, C), x.dtype),
        grid=grid,
        in_specs=[
            pl.BlockSpec((tile_b, C), lambda i: (i, 0)),     # x tile streams
            pl.BlockSpec((C, C), lambda i: (0, 0)),          # w1t resident
            pl.BlockSpec((C, C), lambda i: (0, 0)),          # w2t resident
            pl.BlockSpec((8, C), lambda i: (0, 0)),          # packed vectors
        ],
        out_specs=pl.BlockSpec((tile_b, C), lambda i: (i, 0)),
        compiler_params=pltpu.CompilerParams(
            dimension_semantics=("parallel",),               # megacore on v7x
            vmem_limit_bytes=48 * 1024 * 1024,
        ),
    )(x, prep["w1t"], prep["w2t"], prep["packed"])


def init_params(key, channels):
    """Deterministic init mimicking a fresh PyTorch module."""
    k1, k2, k3, k4 = jax.random.split(key, 4)
    bound = 1.0 / jnp.sqrt(channels)
    return {
        # nn.Linear(channels, channels): weight (C, C), bias (C,)
        "w1": jax.random.uniform(k1, (channels, channels), jnp.float32, -bound, bound),
        "b1": jax.random.uniform(k2, (channels,), jnp.float32, -bound, bound),
        "w2": jax.random.uniform(k3, (channels, channels), jnp.float32, -bound, bound),
        "b2": jax.random.uniform(k4, (channels,), jnp.float32, -bound, bound),
        # nn.LayerNorm(channels): weight=1, bias=0 (fresh-init defaults)
        "g1": jnp.ones((channels,), jnp.float32),
        "be1": jnp.zeros((channels,), jnp.float32),
        "g2": jnp.ones((channels,), jnp.float32),
        "be2": jnp.zeros((channels,), jnp.float32),
    }


def residual_block_ref(x, p, matmul_dtype=jnp.float32):
    """Pure-JAX reference matching PyTorch semantics.

    matmul_dtype=bfloat16 reproduces the kernel's MXU-boundary cast exactly.
    """
    def mm(a, wt):
        return jnp.dot(a.astype(matmul_dtype), wt.astype(matmul_dtype),
                       preferred_element_type=jnp.float32)

    h = mm(x, p["w1"].T) + p["b1"]
    h = _layernorm(h, p["g1"], p["be1"])
    h = jnp.maximum(h, 0.0)
    h = mm(h, p["w2"].T) + p["b2"]
    h = _layernorm(h, p["g2"], p["be2"])
    return jnp.maximum(x + h, 0.0)


if __name__ == "__main__":
    B, C = 8, 128   # small demo; C is lane-dense (multiple of 128)
    key = jax.random.PRNGKey(0)
    kx, kp = jax.random.split(key)
    x = jax.random.normal(kx, (B, C), jnp.float32)
    params = init_params(kp, C)
    prep = prepare_params(params)

    out = residual_block(x, prep)
    out = jax.block_until_ready(out)
    assert out.shape == (B, C)

    # Tight check vs. matched-precision (bf16 MXU inputs, f32 accumulate) ref.
    ref_bf16 = residual_block_ref(x, params, matmul_dtype=jnp.bfloat16)
    err_bf16 = jnp.max(jnp.abs(out - ref_bf16))
    assert jnp.allclose(out, ref_bf16, atol=1e-4, rtol=1e-4), f"max err {err_bf16}"

    # Looser check vs. full-f32 PyTorch-semantics reference.
    ref_f32 = residual_block_ref(x, params, matmul_dtype=jnp.float32)
    err_f32 = jnp.max(jnp.abs(out - ref_f32))
    assert jnp.allclose(out, ref_f32, atol=5e-2, rtol=5e-2), f"max err {err_f32}"

    print("KERNEL_OK")
</pallas_src>

<mosaic_0001>
module attributes {stable_mosaic.version = 11 : i64} {
  func.func @residual_block_kernel(%arg0: i32, %arg1: memref<8x128xf32, #tpu.memory_space<vmem>>, %arg2: memref<128x128xbf16, #tpu.memory_space<vmem>>, %arg3: memref<128x128xbf16, #tpu.memory_space<vmem>>, %arg4: memref<8x128xf32, #tpu.memory_space<vmem>>, %arg5: memref<8x128xf32, #tpu.memory_space<vmem>>) attributes {dimension_semantics = [#tpu.dimension_semantics<parallel>], iteration_bounds = array<i64: 1>, scalar_prefetch = 0 : i64, scratch_operands = 0 : i64, tpu.core_type = #tpu.core_type<tc>, window_params = [{transform_indices = @transform_0, window_bounds = array<i64: 8, 128>}, {pipeline_mode = #tpu.pipeline_mode<synchronous>, transform_indices = @transform_1, window_bounds = array<i64: 128, 128>}, {pipeline_mode = #tpu.pipeline_mode<synchronous>, transform_indices = @transform_2, window_bounds = array<i64: 128, 128>}, {pipeline_mode = #tpu.pipeline_mode<synchronous>, transform_indices = @transform_3, window_bounds = array<i64: 8, 128>}, {transform_indices = @transform_4, window_bounds = array<i64: 8, 128>}]} {
    %c0 = arith.constant 0 : index
    %c0_0 = arith.constant 0 : index
    %0 = vector.load %arg1[%c0, %c0_0] : memref<8x128xf32, #tpu.memory_space<vmem>>, vector<8x128xf32>
    %c0_1 = arith.constant 0 : index
    %c0_2 = arith.constant 0 : index
    %1 = vector.load %arg4[%c0_1, %c0_2] : memref<8x128xf32, #tpu.memory_space<vmem>>, vector<8x128xf32>
    %2 = vector.extract_strided_slice %1 {offsets = [0, 0], sizes = [1, 128], strides = [1, 1]} : vector<8x128xf32> to vector<1x128xf32>
    %3 = vector.extract_strided_slice %1 {offsets = [1, 0], sizes = [1, 128], strides = [1, 1]} : vector<8x128xf32> to vector<1x128xf32>
    %4 = vector.extract_strided_slice %1 {offsets = [2, 0], sizes = [1, 128], strides = [1, 1]} : vector<8x128xf32> to vector<1x128xf32>
    %5 = vector.extract_strided_slice %1 {offsets = [3, 0], sizes = [1, 128], strides = [1, 1]} : vector<8x128xf32> to vector<1x128xf32>
    %6 = vector.extract_strided_slice %1 {offsets = [4, 0], sizes = [1, 128], strides = [1, 1]} : vector<8x128xf32> to vector<1x128xf32>
    %7 = vector.extract_strided_slice %1 {offsets = [5, 0], sizes = [1, 128], strides = [1, 1]} : vector<8x128xf32> to vector<1x128xf32>
    %8 = arith.truncf %0 : vector<8x128xf32> to vector<8x128xbf16>
    %c0_3 = arith.constant 0 : index
    %c0_4 = arith.constant 0 : index
    %9 = vector.load %arg2[%c0_3, %c0_4] : memref<128x128xbf16, #tpu.memory_space<vmem>>, vector<128x128xbf16>
    %cst = arith.constant dense<0.000000e+00> : vector<8x128xf32>
    %10 = tpu.matmul %8, %9, %cst {dimension_numbers = #tpu.dot_dimension_numbers<[1], [0], [0], [1], [0, 0, 1, 1], [], []>} : vector<8x128xbf16>, vector<128x128xbf16>, vector<8x128xf32> -> vector<8x128xf32>
    %11 = vector.broadcast %2 : vector<1x128xf32> to vector<8x128xf32>
    %12 = arith.addf %10, %11 : vector<8x128xf32>
    %cst_5 = arith.constant dense<0.000000e+00> : vector<8xf32>
    %13 = vector.multi_reduction <add>, %12, %cst_5 [1] : vector<8x128xf32> to vector<8xf32>
    %14 = vector.shape_cast %13 : vector<8xf32> to vector<8x1xf32>
    %cst_6 = arith.constant 1.280000e+02 : f32
    %15 = vector.broadcast %cst_6 : f32 to vector<8x1xf32>
    %16 = arith.divf %14, %15 : vector<8x1xf32>
    %17 = arith.mulf %12, %12 : vector<8x128xf32>
    %cst_7 = arith.constant dense<0.000000e+00> : vector<8xf32>
    %18 = vector.multi_reduction <add>, %17, %cst_7 [1] : vector<8x128xf32> to vector<8xf32>
    %19 = vector.shape_cast %18 : vector<8xf32> to vector<8x1xf32>
    %cst_8 = arith.constant 1.280000e+02 : f32
    %20 = vector.broadcast %cst_8 : f32 to vector<8x1xf32>
    %21 = arith.divf %19, %20 : vector<8x1xf32>
    %22 = arith.mulf %16, %16 : vector<8x1xf32>
    %23 = arith.subf %21, %22 : vector<8x1xf32>
    %cst_9 = arith.constant 9.99999974E-6 : f32
    %24 = vector.broadcast %cst_9 : f32 to vector<8x1xf32>
    %25 = arith.addf %23, %24 : vector<8x1xf32>
    %26 = math.rsqrt %25 : vector<8x1xf32>
    %27 = vector.broadcast %16 : vector<8x1xf32> to vector<8x128xf32>
    %28 = arith.subf %12, %27 : vector<8x128xf32>
    %29 = vector.broadcast %26 : vector<8x1xf32> to vector<8x128xf32>
    %30 = arith.mulf %28, %29 : vector<8x128xf32>
    %31 = vector.broadcast %3 : vector<1x128xf32> to vector<8x128xf32>
    %32 = arith.mulf %30, %31 : vector<8x128xf32>
    %33 = vector.broadcast %4 : vector<1x128xf32> to vector<8x128xf32>
    %34 = arith.addf %32, %33 : vector<8x128xf32>
    %cst_10 = arith.constant 0.000000e+00 : f32
    %35 = vector.broadcast %cst_10 : f32 to vector<8x128xf32>
    %36 = arith.maximumf %34, %35 : vector<8x128xf32>
    %37 = arith.truncf %36 : vector<8x128xf32> to vector<8x128xbf16>
    %c0_11 = arith.constant 0 : index
    %c0_12 = arith.constant 0 : index
    %38 = vector.load %arg3[%c0_11, %c0_12] : memref<128x128xbf16, #tpu.memory_space<vmem>>, vector<128x128xbf16>
    %cst_13 = arith.constant dense<0.000000e+00> : vector<8x128xf32>
    %39 = tpu.matmul %37, %38, %cst_13 {dimension_numbers = #tpu.dot_dimension_numbers<[1], [0], [0], [1], [0, 0, 1, 1], [], []>} : vector<8x128xbf16>, vector<128x128xbf16>, vector<8x128xf32> -> vector<8x128xf32>
    %40 = vector.broadcast %5 : vector<1x128xf32> to vector<8x128xf32>
    %41 = arith.addf %39, %40 : vector<8x128xf32>
    %cst_14 = arith.constant dense<0.000000e+00> : vector<8xf32>
    %42 = vector.multi_reduction <add>, %41, %cst_14 [1] : vector<8x128xf32> to vector<8xf32>
    %43 = vector.shape_cast %42 : vector<8xf32> to vector<8x1xf32>
    %cst_15 = arith.constant 1.280000e+02 : f32
    %44 = vector.broadcast %cst_15 : f32 to vector<8x1xf32>
    %45 = arith.divf %43, %44 : vector<8x1xf32>
    %46 = arith.mulf %41, %41 : vector<8x128xf32>
    %cst_16 = arith.constant dense<0.000000e+00> : vector<8xf32>
    %47 = vector.multi_reduction <add>, %46, %cst_16 [1] : vector<8x128xf32> to vector<8xf32>
    %48 = vector.shape_cast %47 : vector<8xf32> to vector<8x1xf32>
    %cst_17 = arith.constant 1.280000e+02 : f32
    %49 = vector.broadcast %cst_17 : f32 to vector<8x1xf32>
    %50 = arith.divf %48, %49 : vector<8x1xf32>
    %51 = arith.mulf %45, %45 : vector<8x1xf32>
    %52 = arith.subf %50, %51 : vector<8x1xf32>
    %cst_18 = arith.constant 9.99999974E-6 : f32
    %53 = vector.broadcast %cst_18 : f32 to vector<8x1xf32>
    %54 = arith.addf %52, %53 : vector<8x1xf32>
    %55 = math.rsqrt %54 : vector<8x1xf32>
    %56 = vector.broadcast %45 : vector<8x1xf32> to vector<8x128xf32>
    %57 = arith.subf %41, %56 : vector<8x128xf32>
    %58 = vector.broadcast %55 : vector<8x1xf32> to vector<8x128xf32>
    %59 = arith.mulf %57, %58 : vector<8x128xf32>
    %60 = vector.broadcast %6 : vector<1x128xf32> to vector<8x128xf32>
    %61 = arith.mulf %59, %60 : vector<8x128xf32>
    %62 = vector.broadcast %7 : vector<1x128xf32> to vector<8x128xf32>
    %63 = arith.addf %61, %62 : vector<8x128xf32>
    %64 = arith.addf %0, %63 : vector<8x128xf32>
    %cst_19 = arith.constant 0.000000e+00 : f32
    %65 = vector.broadcast %cst_19 : f32 to vector<8x128xf32>
    %66 = arith.maximumf %64, %65 : vector<8x128xf32>
    %c0_20 = arith.constant 0 : index
    %c0_21 = arith.constant 0 : index
    %67 = vector.load %arg5[%c0_20, %c0_21] : memref<8x128xf32, #tpu.memory_space<vmem>>, vector<8x128xf32>
    tpu.vector_store %arg5[%c0_20, %c0_21], %66 {strides = array<i32>} : memref<8x128xf32, #tpu.memory_space<vmem>>, vector<8x128xf32>,
    return
  }
  func.func @transform_0(%arg0: i32) -> (i32, i32) {
    %c0_i32 = arith.constant 0 : i32
    %c0_i32_0 = arith.constant 0 : i32
    return %arg0, %c0_i32 : i32, i32
  }
  func.func @transform_1(%arg0: i32) -> (i32, i32) {
    %c0_i32 = arith.constant 0 : i32
    %c0_i32_0 = arith.constant 0 : i32
    %c0_i32_1 = arith.constant 0 : i32
    return %c0_i32, %c0_i32_0 : i32, i32
  }
  func.func @transform_2(%arg0: i32) -> (i32, i32) {
    %c0_i32 = arith.constant 0 : i32
    %c0_i32_0 = arith.constant 0 : i32
    %c0_i32_1 = arith.constant 0 : i32
    return %c0_i32, %c0_i32_0 : i32, i32
  }
  func.func @transform_3(%arg0: i32) -> (i32, i32) {
    %c0_i32 = arith.constant 0 : i32
    %c0_i32_0 = arith.constant 0 : i32
    %c0_i32_1 = arith.constant 0 : i32
    return %c0_i32, %c0_i32_0 : i32, i32
  }
  func.func @transform_4(%arg0: i32) -> (i32, i32) {
    %c0_i32 = arith.constant 0 : i32
    %c0_i32_0 = arith.constant 0 : i32
    return %arg0, %c0_i32 : i32, i32
  }
}

</mosaic_0001>

<bundles_post_ra>
// kernel: tpu_custom_call.1
= control target key start
LH: loop header
LB: loop body
LE: loop exit
PB: predicated region body
PF: predicated region fallthrough
CT: control target
= control target key end

     0   :  { %9 = vsyncpa [#allocation3], 0  ;;  %s602_s0 = inlined_call_operand.hbm [shape: f32[8,128], index: 0, kind: input, shape index: {}]   ;;  %s603_s1 = inlined_call_operand.hbm [shape: bf16[128,128], index: 1, kind: input, shape index: {}]   ;;  %s604_s2 = inlined_call_operand.hbm [shape: bf16[128,128], index: 2, kind: input, shape index: {}]   ;;  %s605_s3 = inlined_call_operand.hbm [shape: f32[8,128], index: 3, kind: input, shape index: {}]   ;;  %s606_s4 = inlined_call_operand.hbm [shape: f32[8,128], index: 4, kind: output, shape index: {}]  }
   0x1   :  { %10 = vsyncpa [#allocation6], 0 }
   0x2   :  { %11 = vsyncpa [#allocation9], 0  ;;  %s28_s17 = sshll.u32 %s603_s1, 4  ;;  %s29_s17 = int_to_ptr.hbm [resolvable:$true] %s28_s17 }
   0x3   :  { %12 = vsyncpa [#allocation4], 0  ;;  %s541_s18 = smov [#allocation5]   ;;  %s18_s22 = sshll.u32 %s602_s0, 4  ;;  %s19_s22 = int_to_ptr.hbm [resolvable:$true] %s18_s22 }
   0x4   :  { %s30_s19 = sshll.u32 %s541_s18, 4  ;;  %s542_s23 = smov 64   ;;  %s31_s19 = int_to_ptr.vmem [resolvable:$true] %s30_s19 }
   0x5   :  { %s543_s24 = smov 4   ;;  %s544_s25 = smov [#allocation2]  }
   0x6   :  { %36 = dma.hbm_to_vmem [thread:$0]  %s29_s17, 1024, %s31_s19, [#allocation6], %s542_s23, %s542_s23, %s543_s24  }
   0x7   :  { %s20_s26 = sshll.u32 %s544_s25, 4  ;;  %s41_s29 = sshll.u32 %s604_s2, 4  ;;  %s21_s26 = int_to_ptr.vmem [resolvable:$true] %s20_s26  ;;  %s42_s29 = int_to_ptr.hbm [resolvable:$true] %s41_s29 }
   0x8   :  { %23 = dma.hbm_to_vmem [thread:$0]  %s19_s22, 128, %s21_s26, [#allocation3]  }
   0x9   :  { %s55_s5 = sshll.u32 %s605_s3, 4  ;;  %s545_s6 = smov [#allocation7]   ;;  %s56_s5 = int_to_ptr.hbm [resolvable:$true] %s55_s5 }
   0xa   :  { %s43_s7 = sshll.u32 %s545_s6, 4  ;;  %s546_s0 = smov [#allocation8]   ;;  %s44_s7 = int_to_ptr.vmem [resolvable:$true] %s43_s7 }
   0xb   :  { %49 = dma.hbm_to_vmem [thread:$0]  %s42_s29, 1024, %s44_s7, [#allocation6], %s542_s23, %s542_s23, %s543_s24  }
   0xc   :  { %s57_s8 = sshll.u32 %s546_s0, 4  ;;  %s58_s8 = int_to_ptr.vmem [resolvable:$true] %s57_s8 }
   0xd   :  { %60 = dma.hbm_to_vmem [thread:$0]  %s56_s5, 128, %s58_s8, [#allocation9]  }
   0xe   :  { %533 = dma.done.wait [#allocation3], 128  }
   0xf   :  { %534 = vsyncadd [#allocation3], 4294967168 }
  0x10   :  { %535 = dma.done.wait [#allocation6], 2048  }
  0x11   :  { %536 = vsyncadd [#allocation6], 4294965248 }
  0x12   :  { %537 = dma.done.wait [#allocation9], 128  }
  0x13   :  { %538 = vsyncadd [#allocation9], 4294967168  ;;  %v390_v0 = vld [vmem:[#allocation5 + $0x38] sm:$0xff]  ;;  %v389_v1 = vld [vmem:[#allocation5 + $0x30] sm:$0xff]  ;;  %v547_v16 = vmov 128.0   ;;  %s548_s2 = smov [#allocation10]  }
  0x14   :  { %145 = vmatpush.bf16.msra.mxu0 %v390_v0  ;;  %v388_v2 = vld [vmem:[#allocation5 + $0x28] sm:$0xff]  ;;  %v387_v3 = vld [vmem:[#allocation5 + $0x20] sm:$0xff]  ;;  %v386_v4 = vld [vmem:[#allocation5 + $0x18] sm:$0xff]  ;;  %407 = vrcp.f32 %v547_v16  ;;  %s305_s3 = sshll.u32 %s548_s2, 4  ;;  %s307_s11 = sshll.u32 %s606_s4, 4  ;;  %s306_s3 = int_to_ptr.vmem [resolvable:$true] %s305_s3  ;;  %s308_s11 = int_to_ptr.hbm [resolvable:$true] %s307_s11 }
  0x15   :  { %v385_v5 = vld [vmem:[#allocation5 + $0x10] sm:$0xff]  ;;  %v384_v6 = vld [vmem:[#allocation5 + $0x8] sm:$0xff]  ;;  %v383_v7 = vld [vmem:[#allocation5] sm:$0xff] }
  0x16   :  { %v586_v8 = vld [vmem:[#allocation2] sm:$0xff]  ;;  %v590_v10 = vld [vmem:[#allocation8] sm:$0xff]  ;;  %v397_v18 = vld [vmem:[#allocation7 + $0x30] sm:$0xff] }
  0x17   :  { %v79_v9 = vpack.c.bf16 %v586_v8, %v586_v8  ;;  %v96_v11 = vperm.slane %v590_v10, 0  ;;  %v398_v17 = vld [vmem:[#allocation7 + $0x38] sm:$0xff]  ;;  %v396_v21 = vld [vmem:[#allocation7 + $0x28] sm:$0xff]  ;;  %v395_v23 = vld [vmem:[#allocation7 + $0x20] sm:$0xff]  ;;  %v187_v45 = vperm.slane %v590_v10, 1  ;;  %v189_v48 = vperm.slane %v590_v10, 2 }
  0x18   :  { %146 = vmatpush.bf16.msra.mxu0 %v389_v1  ;;  %258 = vmatpush.bf16.msra.mxu1 %v398_v17  ;;  %v394_v25 = vld [vmem:[#allocation7 + $0x18] sm:$0xff]  ;;  %v393_v26 = vld [vmem:[#allocation7 + $0x10] sm:$0xff]  ;;  %v392_v29 = vld [vmem:[#allocation7 + $0x8] sm:$0xff]  ;;  %v209_v53 = vperm.slane %v590_v10, 3 }
  0x19   :  { %v391_v31 = vld [vmem:[#allocation7] sm:$0xff] }
  0x1a   :  { %v408_v19 = vpop.eup %407 }
  0x1b   :  { %v161_v20 = vmul.f32 128.0, %v408_v19  ;;  %vm165_vm0 = vweird.f32 %v408_v19 }
  0x1c   :  { %147 = vmatpush.bf16.msra.mxu0 %v388_v2  ;;  %259 = vmatpush.bf16.msra.mxu1 %v397_v18 }
  0x1d   :  { %v162_v22 = vsub.f32 1.0, %v161_v20 }
  0x1f   :  { %v163_v24 = vmul.f32 %v408_v19, %v162_v22 }
  0x20   :  { %148 = vmatpush.bf16.msra.mxu0 %v387_v3  ;;  %260 = vmatpush.bf16.msra.mxu1 %v396_v21 }
  0x21   :  { %v164_v27 = vadd.f32 %v408_v19, %v163_v24 }
  0x23   :  { %v166_v30 = vsel %vm165_vm0, %v408_v19, %v164_v27 }
  0x24   :  { %149 = vmatpush.bf16.msra.mxu0 %v386_v4  ;;  %261 = vmatpush.bf16.msra.mxu1 %v395_v23 }
  0x28   :  { %150 = vmatpush.bf16.msra.mxu0 %v385_v5  ;;  %262 = vmatpush.bf16.msra.mxu1 %v394_v25 }
  0x2c   :  { %151 = vmatpush.bf16.msra.mxu0 %v384_v6  ;;  %263 = vmatpush.bf16.msra.mxu1 %v393_v26 }
  0x30   :  { %152 = vmatpush.bf16.msra.mxu0 %v383_v7  ;;  %264 = vmatpush.bf16.msra.mxu1 %v392_v29 }
  0x33   :  { %153 = vmatmul.bf16.vlgmr.msra.gmra.mxu0 %v79_v9  ;;  %v293_v9 = vperm.slane %v590_v10, 4 }
  0x34   :  { %265 = vmatpush.bf16.msra.mxu1 %v391_v31 }
  0xb0   :  { %v154_v12 = vpop.f32.mrf.mxu0 }
  0xb1   :  { %v155_v13 = vadd.f32 %v154_v12, %v96_v11 }
  0xb3   :  { %158 = vadd.xlane.f32.xlu0 %v155_v13  ;;  %v168_v15 = vmul.f32 %v155_v13, %v155_v13 }
  0xb8   :  { %v156_v14 = vpop.f32.mrf.mxu0 }
  0xbb   :  { %169 = vadd.xlane.f32.xlu0 %v168_v15 }
 0x126   :  { %v159_v28 = vpop.xlane.xlu0 %158 }
 0x127   :  { %v167_v32 = vmul.f32 %v166_v30, %v159_v28 }
 0x129   :  { %v172_v34 = vmul.f32 %v167_v32, %v167_v32  ;;  %v185_v44 = vsub.f32 %v155_v13, %v167_v32  ;;  %v295_v13 = vperm.slane %v590_v10, 5 }
 0x12e   :  { %v170_v33 = vpop.xlane.xlu0 %169 }
 0x12f   :  { %v171_v35 = vmul.f32 %v170_v33, %v166_v30 }
 0x131   :  { %v173_v36 = vsub.f32 %v171_v35, %v172_v34 }
 0x133   :  { %v174_v37 = vadd.f32 1e-05, %v173_v36 }
 0x135   :  { %409 = vrsqrt.f32 %v174_v37  ;;  %vm181_vm2 = vweird.f32 %v174_v37 }
 0x13b   :  { %v410_v38 = vpop.eup %409 }
 0x13c   :  { %v176_v39 = vmul.f32 %v410_v38, %v174_v37  ;;  %vm182_vm1 = vweird.f32 %v410_v38 }
 0x13d   :  { %vm183_vm3 = vmor %vm181_vm2, %vm182_vm1 }
 0x13e   :  { %v177_v40 = vmul.f32 %v410_v38, %v176_v39 }
 0x140   :  { %v178_v41 = vmul.f32 0.5, %v177_v40 }
 0x142   :  { %v179_v42 = vsub.f32 1.5, %v178_v41 }
 0x144   :  { %v180_v43 = vmul.f32 %v410_v38, %v179_v42 }
 0x146   :  { %v184_v46 = vsel %vm183_vm3, %v410_v38, %v180_v43 }
 0x147   :  { %v186_v47 = vmul.f32 %v185_v44, %v184_v46 }
 0x149   :  { %v188_v49 = vmul.f32 %v187_v45, %v186_v47 }
 0x14b   :  { %v190_v50 = vadd.f32 %v189_v48, %v188_v49 }
 0x14d   :  { %v191_v51 = vmax.f32 %v190_v50, 0.0 }
 0x14f   :  { %v192_v52 = vpack.c.bf16 %v191_v51, %v191_v51 }
 0x151   :  { %266 = vmatmul.bf16.vlgmr.msra.gmra.mxu1 %v192_v52 }
 0x1ce   :  { %v267_v54 = vpop.f32.mrf.mxu1 }
 0x1cf   :  { %v268_v55 = vadd.f32 %v267_v54, %v209_v53 }
 0x1d1   :  { %271 = vadd.xlane.f32.xlu1 %v268_v55  ;;  %v274_v57 = vmul.f32 %v268_v55, %v268_v55 }
 0x1d6   :  { %v269_v56 = vpop.f32.mrf.mxu1 }
 0x1d9   :  { %275 = vadd.xlane.f32.xlu1 %v274_v57 }
 0x244   :  { %v272_v58 = vpop.xlane.xlu1 %271 }
 0x245   :  { %v273_v59 = vmul.f32 %v272_v58, %v166_v30 }
 0x247   :  { %v278_v61 = vmul.f32 %v273_v59, %v273_v59  ;;  %v291_v7 = vsub.f32 %v268_v55, %v273_v59 }
 0x24c   :  { %v276_v60 = vpop.xlane.xlu1 %275 }
 0x24d   :  { %v277_v62 = vmul.f32 %v276_v60, %v166_v30 }
 0x24f   :  { %v279_v63 = vsub.f32 %v277_v62, %v278_v61 }
 0x251   :  { %v280_v0 = vadd.f32 1e-05, %v279_v63 }
 0x253   :  { %411 = vrsqrt.f32 %v280_v0  ;;  %vm287_vm5 = vweird.f32 %v280_v0 }
 0x259   :  { %v412_v1 = vpop.eup %411 }
 0x25a   :  { %v282_v2 = vmul.f32 %v412_v1, %v280_v0  ;;  %vm288_vm4 = vweird.f32 %v412_v1 }
 0x25b   :  { %vm289_vm6 = vmor %vm287_vm5, %vm288_vm4 }
 0x25c   :  { %v283_v3 = vmul.f32 %v412_v1, %v282_v2 }
 0x25e   :  { %v284_v4 = vmul.f32 0.5, %v283_v3 }
 0x260   :  { %v285_v5 = vsub.f32 1.5, %v284_v4 }
 0x262   :  { %v286_v6 = vmul.f32 %v412_v1, %v285_v5 }
 0x264   :  { %v290_v11 = vsel %vm289_vm6, %v412_v1, %v286_v6 }
 0x265   :  { %v292_v12 = vmul.f32 %v291_v7, %v290_v11 }
 0x267   :  { %v294_v14 = vmul.f32 %v293_v9, %v292_v12 }
 0x269   :  { %v296_v15 = vadd.f32 %v295_v13, %v294_v14 }
 0x26b   :  { %v297_v16 = vadd.f32 %v296_v15, %v586_v8 }
 0x26d   :  { %v298_v17 = vmax.f32 %v297_v16, 0.0 }
 0x26f   :  { %299 = vst [vmem:[#allocation10] sm:$0xff] %v298_v17 }
 0x270   :  { %310 = dma.vmem_to_hbm [thread:$0]  %s306_s3, 128, %s308_s11, [#allocation4]  }
 0x271   :  { %539 = dma.done.wait [#allocation4], 128  }
 0x272   :  { %540 = vsyncadd [#allocation4], 4294967168 }
 0x273   :  { %315 = vsyncpa [#allocation3], 1 }
 0x274   :  { %316 = vsyncpa [#allocation6], 1 }
 0x275   :  { %317 = vsyncpa [#allocation9], 1 }
 0x276   :  { %318 = vsyncpa [#allocation4], 1 }

</bundles_post_ra>
